<compile_context>
chip_gen: v6e
topology: v6e:2x2x1
jax: 0.10.0
libtpu: 0.0.40
codegen_flags: <defaults>
</compile_context>

<pallas_src>
import functools

import jax
import jax.numpy as jnp
from jax.experimental import pallas as pl
from jax.experimental.pallas import tpu as pltpu


def _rope_kernel(x_ref, cos_ref, sin_lo_ref, sin_hi_ref, o_ref, *, d2: int, lanes: int):
    """Pure VPU FMAs + two XLU rolls; no concats, no lane slicing.

    x_ref      : (TS, N, L) input tile
    cos_ref    : (TS, 1, L) cos, padded with 1.0 beyond feature d
    sin_lo_ref : (TS, 1, L) -sin on features [0, d/2), 0 elsewhere
    sin_hi_ref : (TS, 1, L) +sin on features [d/2, d), 0 elsewhere
    o_ref      : (TS, N, L) output tile
    """
    x = x_ref[...]
    cos = cos_ref[...]          # broadcasts over N (sublane broadcast)
    sin_lo = sin_lo_ref[...]
    sin_hi = sin_hi_ref[...]

    # roll(x, L - d2)[j] == x[(j + d2) % L]  -> partner for lower rotated half
    # roll(x, d2)[j]     == x[(j - d2) % L]  -> partner for upper rotated half
    # Wrap-around / cross-head lanes are neutralized because sin_lo / sin_hi are
    # zero there (only in-block, in-range lanes have nonzero sin).
    r_lo = pltpu.roll(x, shift=lanes - d2, axis=2)
    r_hi = pltpu.roll(x, shift=d2, axis=2)

    out = x * cos + r_lo * sin_lo + r_hi * sin_hi
    o_ref[...] = out.astype(o_ref.dtype)


def rotary_positional_encoder(x: jax.Array, d: int, base: int = 10000,
                              *, block_rows: int | None = None) -> jax.Array:
    """Pallas-TPU RoPE forward matching RotaryPositionalEncoder.forward.

    x: [seq_len, batch, n_heads, features], features >= d, d even.
    """
    assert d % 2 == 0 and d >= 2, "d must be even and >= 2"
    S, B, H, F = x.shape
    assert F >= d
    d2 = d // 2

    # --- lane-dense 3-D layout (contiguous merges only) --------------------
    if F >= 128 or H == 1:
        N, L = B * H, F          # (S, B*H, F): head dim already lane-wide
    else:
        N, L = B, H * F          # (S, B, H*F): merge heads into lanes
    reps = L // F
    x3 = x.reshape(S, N, L)

    # --- _build_cache (plain JAX glue), padded + sign-folded ---------------
    theta = 1.0 / (base ** (jnp.arange(0, d, 2, dtype=jnp.float32) / d))     # (d/2,)
    angle = jnp.arange(S, dtype=jnp.float32)[:, None] * theta[None, :]        # (S, d/2)
    angle = jnp.concatenate([angle, angle], axis=1)                           # (S, d)
    cos_d, sin_d = jnp.cos(angle), jnp.sin(angle)
    cos_p = jnp.pad(cos_d, ((0, 0), (0, F - d)), constant_values=1.0)         # (S, F)
    sin_lo = jnp.pad(-sin_d[:, :d2], ((0, 0), (0, F - d2)))                   # (S, F)
    sin_hi = jnp.pad(sin_d[:, d2:], ((0, 0), (d2, F - d)))                    # (S, F)

    def tile3(c):
        return jnp.tile(c, (1, reps)).reshape(S, 1, L).astype(x.dtype)

    cos_p, sin_lo, sin_hi = tile3(cos_p), tile3(sin_lo), tile3(sin_hi)

    # --- sequence-row tiling: ~2 MiB input blocks --------------------------
    # 2 MiB per x block => <= ~8 MiB live with double-buffered in+out, which
    # fits the default scoped VMEM on v5e (16 MiB) / v6e / v7x (32 MiB).
    if block_rows is None:
        row_bytes = N * L * x.dtype.itemsize
        ts = max(1, (2 * 1024 * 1024) // max(row_bytes, 1))
        ts = max(8, (ts // 8) * 8)
    else:
        ts = block_rows
    ts = min(ts, S)
    grid = (pl.cdiv(S, ts),)

    kernel = functools.partial(_rope_kernel, d2=d2, lanes=L)
    flops = 5 * S * N * L
    bytes_accessed = 2 * x3.size * x3.dtype.itemsize + 3 * cos_p.size * cos_p.dtype.itemsize

    # TODO(synk): add input_output_aliases={0: 0} when the caller donates x.
    out = pl.pallas_call(
        kernel,
        out_shape=jax.ShapeDtypeStruct((S, N, L), x.dtype),
        grid_spec=pltpu.PrefetchScalarGridSpec(
            num_scalar_prefetch=0,
            grid=grid,
            in_specs=[
                pl.BlockSpec((ts, N, L), lambda s: (s, 0, 0)),
                pl.BlockSpec((ts, 1, L), lambda s: (s, 0, 0)),
                pl.BlockSpec((ts, 1, L), lambda s: (s, 0, 0)),
                pl.BlockSpec((ts, 1, L), lambda s: (s, 0, 0)),
            ],
            out_specs=pl.BlockSpec((ts, N, L), lambda s: (s, 0, 0)),
        ),
        compiler_params=pltpu.CompilerParams(dimension_semantics=("parallel",)),
        cost_estimate=pl.CostEstimate(flops=flops, transcendentals=0,
                                      bytes_accessed=bytes_accessed),
    )(x3, cos_p, sin_lo, sin_hi)

    return out.reshape(S, B, H, F)


def _reference(x: jax.Array, d: int, base: int = 10000) -> jax.Array:
    """Pure-JAX port of the PyTorch forward, for verification."""
    seq_len = x.shape[0]
    theta = 1.0 / (base ** (jnp.arange(0, d, 2, dtype=jnp.float32) / d))
    seq_idx = jnp.arange(seq_len, dtype=jnp.float32)
    idx_theta = seq_idx[:, None] * theta[None, :]
    idx_theta2 = jnp.concatenate([idx_theta, idx_theta], axis=1)
    cos = jnp.cos(idx_theta2)[:, None, None, :]
    sin = jnp.sin(idx_theta2)[:, None, None, :]
    x_rope, x_pass = x[..., :d], x[..., d:]
    d2 = d // 2
    neg_half = jnp.concatenate([-x_rope[..., d2:], x_rope[..., :d2]], axis=-1)
    x_rope = x_rope * cos + neg_half * sin
    return jnp.concatenate([x_rope, x_pass], axis=-1)


if __name__ == "__main__":
    # x: [seq_len, batch, n_heads, features]; rotate the first d features.
    seq_len, batch, n_heads, features = 8, 2, 4, 32
    d = 24  # even, < features so the pass-through path is exercised

    key = jax.random.PRNGKey(0)
    x = jax.random.normal(key, (seq_len, batch, n_heads, features), dtype=jnp.float32)

    out = rotary_positional_encoder(x, d=d, base=10000)
    out = jax.block_until_ready(out)

    ref = _reference(x, d=d, base=10000)
    assert out.shape == x.shape and out.dtype == x.dtype
    assert jnp.allclose(out, ref, atol=1e-5, rtol=1e-5), "mismatch vs reference"

    print("KERNEL_OK")
</pallas_src>

<mosaic_0001>
module attributes {stable_mosaic.version = 11 : i64} {
  func.func @_rope_kernel(%arg0: i32, %arg1: memref<8x2x128xf32, #tpu.memory_space<vmem>>, %arg2: memref<8x1x128xf32, #tpu.memory_space<vmem>>, %arg3: memref<8x1x128xf32, #tpu.memory_space<vmem>>, %arg4: memref<8x1x128xf32, #tpu.memory_space<vmem>>, %arg5: memref<8x2x128xf32, #tpu.memory_space<vmem>>) attributes {dimension_semantics = [#tpu.dimension_semantics<parallel>], iteration_bounds = array<i64: 1>, scalar_prefetch = 0 : i64, scratch_operands = 0 : i64, tpu.core_type = #tpu.core_type<tc>, window_params = [{transform_indices = @transform_0, window_bounds = array<i64: 8, 2, 128>}, {transform_indices = @transform_1, window_bounds = array<i64: 8, 1, 128>}, {transform_indices = @transform_2, window_bounds = array<i64: 8, 1, 128>}, {transform_indices = @transform_3, window_bounds = array<i64: 8, 1, 128>}, {transform_indices = @transform_4, window_bounds = array<i64: 8, 2, 128>}]} {
    %c0 = arith.constant 0 : index
    %c0_0 = arith.constant 0 : index
    %c0_1 = arith.constant 0 : index
    %0 = vector.load %arg1[%c0, %c0_0, %c0_1] : memref<8x2x128xf32, #tpu.memory_space<vmem>>, vector<8x2x128xf32>
    %c0_2 = arith.constant 0 : index
    %c0_3 = arith.constant 0 : index
    %c0_4 = arith.constant 0 : index
    %1 = vector.load %arg2[%c0_2, %c0_3, %c0_4] : memref<8x1x128xf32, #tpu.memory_space<vmem>>, vector<8x1x128xf32>
    %c0_5 = arith.constant 0 : index
    %c0_6 = arith.constant 0 : index
    %c0_7 = arith.constant 0 : index
    %2 = vector.load %arg3[%c0_5, %c0_6, %c0_7] : memref<8x1x128xf32, #tpu.memory_space<vmem>>, vector<8x1x128xf32>
    %c0_8 = arith.constant 0 : index
    %c0_9 = arith.constant 0 : index
    %c0_10 = arith.constant 0 : index
    %3 = vector.load %arg4[%c0_8, %c0_9, %c0_10] : memref<8x1x128xf32, #tpu.memory_space<vmem>>, vector<8x1x128xf32>
    %c116_i32 = arith.constant 116 : i32
    %4 = tpu.dynamic_rotate %0 by %c116_i32 dim 2 : vector<8x2x128xf32>, i32 -> vector<8x2x128xf32>
    %c12_i32 = arith.constant 12 : i32
    %5 = tpu.dynamic_rotate %0 by %c12_i32 dim 2 : vector<8x2x128xf32>, i32 -> vector<8x2x128xf32>
    %6 = vector.broadcast %1 : vector<8x1x128xf32> to vector<8x2x128xf32>
    %7 = arith.mulf %0, %6 : vector<8x2x128xf32>
    %8 = vector.broadcast %2 : vector<8x1x128xf32> to vector<8x2x128xf32>
    %9 = arith.mulf %4, %8 : vector<8x2x128xf32>
    %10 = arith.addf %7, %9 : vector<8x2x128xf32>
    %11 = vector.broadcast %3 : vector<8x1x128xf32> to vector<8x2x128xf32>
    %12 = arith.mulf %5, %11 : vector<8x2x128xf32>
    %13 = arith.addf %10, %12 : vector<8x2x128xf32>
    %c0_11 = arith.constant 0 : index
    %c0_12 = arith.constant 0 : index
    %c0_13 = arith.constant 0 : index
    %14 = vector.load %arg5[%c0_11, %c0_12, %c0_13] : memref<8x2x128xf32, #tpu.memory_space<vmem>>, vector<8x2x128xf32>
    tpu.vector_store %arg5[%c0_11, %c0_12, %c0_13], %13 {strides = array<i32>} : memref<8x2x128xf32, #tpu.memory_space<vmem>>, vector<8x2x128xf32>,
    return
  }
  func.func @transform_0(%arg0: i32) -> (i32, i32, i32) {
    %c0_i32 = arith.constant 0 : i32
    %c0_i32_0 = arith.constant 0 : i32
    %c0_i32_1 = arith.constant 0 : i32
    return %arg0, %c0_i32, %c0_i32_0 : i32, i32, i32
  }
  func.func @transform_1(%arg0: i32) -> (i32, i32, i32) {
    %c0_i32 = arith.constant 0 : i32
    %c0_i32_0 = arith.constant 0 : i32
    %c0_i32_1 = arith.constant 0 : i32
    return %arg0, %c0_i32, %c0_i32_0 : i32, i32, i32
  }
  func.func @transform_2(%arg0: i32) -> (i32, i32, i32) {
    %c0_i32 = arith.constant 0 : i32
    %c0_i32_0 = arith.constant 0 : i32
    %c0_i32_1 = arith.constant 0 : i32
    return %arg0, %c0_i32, %c0_i32_0 : i32, i32, i32
  }
  func.func @transform_3(%arg0: i32) -> (i32, i32, i32) {
    %c0_i32 = arith.constant 0 : i32
    %c0_i32_0 = arith.constant 0 : i32
    %c0_i32_1 = arith.constant 0 : i32
    return %arg0, %c0_i32, %c0_i32_0 : i32, i32, i32
  }
  func.func @transform_4(%arg0: i32) -> (i32, i32, i32) {
    %c0_i32 = arith.constant 0 : i32
    %c0_i32_0 = arith.constant 0 : i32
    %c0_i32_1 = arith.constant 0 : i32
    return %arg0, %c0_i32, %c0_i32_0 : i32, i32, i32
  }
}

</mosaic_0001>

<bundles_post_ra>
// kernel: tpu_custom_call.1
= control target key start
LH: loop header
LB: loop body
LE: loop exit
PB: predicated region body
PF: predicated region fallthrough
CT: control target
= control target key end

     0   :  { %9 = vsyncpa [#allocation3], 0  ;;  %s567_s0 = inlined_call_operand.hbm [shape: f32[8,2,128], index: 0, kind: input, shape index: {}]   ;;  %s568_s1 = inlined_call_operand.hbm [shape: f32[8,1,128], index: 1, kind: input, shape index: {}]   ;;  %s569_s2 = inlined_call_operand.hbm [shape: f32[8,1,128], index: 2, kind: input, shape index: {}]   ;;  %s570_s3 = inlined_call_operand.hbm [shape: f32[8,1,128], index: 3, kind: input, shape index: {}]   ;;  %s571_s4 = inlined_call_operand.hbm [shape: f32[8,2,128], index: 4, kind: output, shape index: {}]  }
   0x1   :  { %10 = vsyncpa [#allocation6], 0 }
   0x2   :  { %11 = vsyncpa [#allocation9], 0 }
   0x3   :  { %12 = vsyncpa [#allocation4], 0  ;;  %s491_s15 = smov [#allocation5]  }
   0x4   :  { %s30_s16 = sshll.u32 %s491_s15, 4  ;;  %s31_s16 = int_to_ptr.vmem [resolvable:$true] %s30_s16 }
   0x5   :  { %s391_s17 = scalar_lea.vmem %s31_s16, 128  ;;  %p396_p1 = scmp.lt.s32.totalorder %s31_s16, %s31_s16 }
   0x6   :  { %p392_p0 = scmp.ne.s32.totalorder %s31_s16, %s391_s17  ;;  %p397_p2 = scmp.lt.s32.totalorder %s391_s17, %s391_s17 }
   0x8   :  { %p398_p3 = por %p397_p2, %p396_p1 }
   0xa   :  { %p399_p4 = pnand %p398_p3, %p392_p0 }
   0xc   :  { %402 = shalt.err (!%p399_p4)
}
   0xd   :  { %s492_s18 = smov 16   ;;  %s493_s19 = smov 1  }
   0xe   :  { %36 = dma.hbm_to_vmem [thread:$0]  %s568_s1, 128, %s31_s16, [#allocation6], %s492_s18, %s492_s18, %s493_s19  }
   0xf   :  { %s494_s22 = smov [#allocation2]  }
  0x10   :  { %s18_s23 = sshll.u32 %s494_s22, 4  ;;  %s19_s23 = int_to_ptr.vmem [resolvable:$true] %s18_s23 }
  0x11   :  { %s411_s24 = scalar_lea.vmem %s19_s23, 256  ;;  %p416_p6 = scmp.lt.s32.totalorder %s19_s23, %s19_s23 }
  0x12   :  { %p412_p5 = scmp.ne.s32.totalorder %s19_s23, %s411_s24  ;;  %p417_p7 = scmp.lt.s32.totalorder %s411_s24, %s411_s24 }
  0x14   :  { %p418_p8 = por %p417_p7, %p416_p6 }
  0x16   :  { %p419_p9 = pnand %p418_p8, %p412_p5 }
  0x18   :  { %422 = shalt.err (!%p419_p9)
}
  0x19   :  { %s495_s25 = smov 32   ;;  %s496_s26 = smov 2  }
  0x1a   :  { %24 = dma.hbm_to_vmem [thread:$0]  %s567_s0, 256, %s19_s23, [#allocation3], %s495_s25, %s495_s25, %s496_s26  }
  0x1b   :  { %s497_s1 = smov [#allocation7]   ;;  %s498_s30 = smov [#allocation8]  }
  0x1c   :  { %s42_s29 = sshll.u32 %s497_s1, 4  ;;  %s54_s5 = sshll.u32 %s498_s30, 4  ;;  %s43_s29 = int_to_ptr.vmem [resolvable:$true] %s42_s29  ;;  %s55_s5 = int_to_ptr.vmem [resolvable:$true] %s54_s5 }
  0x1d   :  { %s431_s6 = scalar_lea.vmem %s43_s29, 128  ;;  %p436_p11 = scmp.lt.s32.totalorder %s43_s29, %s43_s29 }
  0x1e   :  { %p432_p10 = scmp.ne.s32.totalorder %s43_s29, %s431_s6  ;;  %p437_p12 = scmp.lt.s32.totalorder %s431_s6, %s431_s6 }
  0x20   :  { %p438_p13 = por %p437_p12, %p436_p11 }
  0x22   :  { %p439_p0 = pnand %p438_p13, %p432_p10 }
  0x24   :  { %442 = shalt.err (!%p439_p0)
}
  0x25   :  { %48 = dma.hbm_to_vmem [thread:$0]  %s569_s2, 128, %s43_s29, [#allocation6], %s492_s18, %s492_s18, %s493_s19  }
  0x26   :  { %s451_s0 = scalar_lea.vmem %s55_s5, 128  ;;  %p456_p2 = scmp.lt.s32.totalorder %s55_s5, %s55_s5 }
  0x27   :  { %p452_p1 = scmp.ne.s32.totalorder %s55_s5, %s451_s0  ;;  %p457_p3 = scmp.lt.s32.totalorder %s451_s0, %s451_s0 }
  0x29   :  { %p458_p4 = por %p457_p3, %p456_p2 }
  0x2b   :  { %p459_p5 = pnand %p458_p4, %p452_p1 }
  0x2d   :  { %462 = shalt.err (!%p459_p5)
}
  0x2e   :  { %60 = dma.hbm_to_vmem [thread:$0]  %s570_s3, 128, %s55_s5, [#allocation9], %s492_s18, %s492_s18, %s493_s19  }
  0x2f   :  { %483 = dma.done.wait [#allocation3], 256  }
  0x30   :  { %484 = vsyncadd [#allocation3], 4294967040 }
  0x31   :  { %485 = dma.done.wait [#allocation6], 256  }
  0x32   :  { %486 = vsyncadd [#allocation6], 4294967040 }
  0x33   :  { %487 = dma.done.wait [#allocation9], 128  }
  0x34   :  { %488 = vsyncadd [#allocation9], 4294967168  ;;  %v75_v0 = vld [vmem:[#allocation2 + $0x4] sm:$0x3]  ;;  %v73_v1 = vld [vmem:[#allocation2] sm:$0x3] }
  0x35   :  { %s499_s2 = smov 116   ;;  %v76_v2 = vld [vmem:[#allocation2 + $0x6] sm:$0x3]  ;;  %v74_v3 = vld [vmem:[#allocation2 + $0x2] sm:$0x3]  ;;  %s500_s3 = smov 12  }
  0x36   :  { %109 = vrot.lane.b32.xlu1 %v75_v0, %s499_s2  ;;  %105 = vrot.lane.b32.xlu0 %v73_v1, %s499_s2  ;;  %v78_v4 = vld [vmem:[#allocation2 + $0xa] sm:$0x3]  ;;  %v77_v5 = vld [vmem:[#allocation2 + $0x8] sm:$0x3]  ;;  %v551_v6 = vld [vmem:[#allocation2 + $0xe] sm:$0x3] }
  0x37   :  { %v553_v7 = vld [vmem:[#allocation2 + $0xc] sm:$0x3]  ;;  %v348_v14 = vld [vmem:[#allocation5] ss:$0 sm:$0xff]  ;;  %v356_v15 = vld [vmem:[#allocation7] ss:$0 sm:$0xff] }
  0x38   :  { %v349_v16 = vld [vmem:[#allocation5 + $0x1] ss:$0 sm:$0xff]  ;;  %v357_v17 = vld [vmem:[#allocation7 + $0x1] ss:$0 sm:$0xff]  ;;  %v185_v18 = vmul.f32 %v348_v14, %v73_v1  ;;  %v350_v22 = vld [vmem:[#allocation5 + $0x2] ss:$0 sm:$0xff] }
  0x39   :  { %v351_v23 = vld [vmem:[#allocation5 + $0x3] ss:$0 sm:$0xff]  ;;  %v186_v24 = vmul.f32 %v349_v16, %v74_v3  ;;  %v358_v25 = vld [vmem:[#allocation7 + $0x2] ss:$0 sm:$0xff]  ;;  %v359_v27 = vld [vmem:[#allocation7 + $0x3] ss:$0 sm:$0xff]  ;;  %v187_v30 = vmul.f32 %v350_v22, %v75_v0 }
  0x3a   :  { %111 = vrot.lane.b32.xlu1 %v76_v2, %s499_s2  ;;  %107 = vrot.lane.b32.xlu0 %v74_v3, %s499_s2  ;;  %v365_v28 = vld [vmem:[#allocation8 + $0x1] ss:$0 sm:$0xff]  ;;  %v364_v29 = vld [vmem:[#allocation8] ss:$0 sm:$0xff]  ;;  %v188_v31 = vmul.f32 %v351_v23, %v76_v2  ;;  %v353_v32 = vld [vmem:[#allocation5 + $0x5] ss:$0 sm:$0xff] }
  0x3b   :  { %v352_v37 = vld [vmem:[#allocation5 + $0x4] ss:$0 sm:$0xff]  ;;  %v361_v40 = vld [vmem:[#allocation7 + $0x5] ss:$0 sm:$0xff]  ;;  %v360_v41 = vld [vmem:[#allocation7 + $0x4] ss:$0 sm:$0xff]  ;;  %v190_v48 = vmul.f32 %v353_v32, %v78_v4 }
  0x3c   :  { %v367_v44 = vld [vmem:[#allocation8 + $0x3] ss:$0 sm:$0xff]  ;;  %v366_v45 = vld [vmem:[#allocation8 + $0x2] ss:$0 sm:$0xff]  ;;  %v189_v49 = vmul.f32 %v352_v37, %v77_v5  ;;  %v355_v54 = vld [vmem:[#allocation5 + $0x7] ss:$0 sm:$0xff] }
  0x3d   :  { %v354_v55 = vld [vmem:[#allocation5 + $0x6] ss:$0 sm:$0xff]  ;;  %v363_v58 = vld [vmem:[#allocation7 + $0x7] ss:$0 sm:$0xff]  ;;  %v362_v61 = vld [vmem:[#allocation7 + $0x6] ss:$0 sm:$0xff] }
  0x3e   :  { %115 = vrot.lane.b32.xlu1 %v78_v4, %s499_s2  ;;  %113 = vrot.lane.b32.xlu0 %v77_v5, %s499_s2  ;;  %v369_v62 = vld [vmem:[#allocation8 + $0x5] ss:$0 sm:$0xff]  ;;  %v368_v63 = vld [vmem:[#allocation8 + $0x4] ss:$0 sm:$0xff]  ;;  %v371_v14 = vld [vmem:[#allocation8 + $0x7] ss:$0 sm:$0xff] }
  0x3f   :  { %s501_s11 = smov [#allocation10]  }
  0x40   :  { %s334_s12 = sshll.u32 %s501_s11, 4  ;;  %s335_s12 = int_to_ptr.vmem [resolvable:$true] %s334_s12 }
  0x41   :  { %s463_s13 = scalar_lea.vmem %s335_s12, 256  ;;  %p468_p7 = scmp.lt.s32.totalorder %s335_s12, %s335_s12 }
  0x42   :  { %119 = vrot.lane.b32.xlu1 %v551_v6, %s499_s2  ;;  %117 = vrot.lane.b32.xlu0 %v553_v7, %s499_s2  ;;  %p464_p6 = scmp.ne.s32.totalorder %s335_s12, %s463_s13  ;;  %p469_p8 = scmp.lt.s32.totalorder %s463_s13, %s463_s13 }
  0x44   :  { %p470_p9 = por %p469_p8, %p468_p7 }
  0x46   :  { %123 = vrot.lane.b32.xlu1 %v74_v3, %s500_s3  ;;  %121 = vrot.lane.b32.xlu0 %v73_v1, %s500_s3  ;;  %v191_v3 = vmul.f32 %v354_v55, %v553_v7  ;;  %p471_p10 = pnand %p470_p9, %p464_p6 }
  0x4a   :  { %127 = vrot.lane.b32.xlu1 %v76_v2, %s500_s3  ;;  %125 = vrot.lane.b32.xlu0 %v75_v0, %s500_s3  ;;  %v192_v2 = vmul.f32 %v355_v54, %v551_v6 }
  0x4e   :  { %131 = vrot.lane.b32.xlu1 %v78_v4, %s500_s3  ;;  %129 = vrot.lane.b32.xlu0 %v77_v5, %s500_s3 }
  0x52   :  { %135 = vrot.lane.b32.xlu1 %v551_v6, %s500_s3  ;;  %133 = vrot.lane.b32.xlu0 %v553_v7, %s500_s3 }
  0xa8   :  { %v110_v8 = vpop.permute.xlu1 %109  ;;  %v106_v9 = vpop.permute.xlu0 %105 }
  0xa9   :  { %v241_v19 = vmul.f32 %v356_v15, %v106_v9  ;;  %v243_v33 = vmul.f32 %v358_v25, %v110_v8  ;;  %v370_v15 = vld [vmem:[#allocation8 + $0x6] ss:$0 sm:$0xff] }
  0xab   :  { %v249_v34 = vadd.f32 %v241_v19, %v185_v18  ;;  %v251_v56 = vadd.f32 %v243_v33, %v187_v30 }
  0xac   :  { %v112_v10 = vpop.permute.xlu1 %111  ;;  %v108_v11 = vpop.permute.xlu0 %107 }
  0xad   :  { %v242_v26 = vmul.f32 %v357_v17, %v108_v11  ;;  %v244_v38 = vmul.f32 %v359_v27, %v112_v10 }
  0xaf   :  { %v250_v39 = vadd.f32 %v242_v26, %v186_v24  ;;  %v252_v57 = vadd.f32 %v244_v38, %v188_v31 }
  0xb0   :  { %v116_v12 = vpop.permute.xlu1 %115  ;;  %v114_v13 = vpop.permute.xlu0 %113 }
  0xb1   :  { %v246_v50 = vmul.f32 %v361_v40, %v116_v12  ;;  %v245_v51 = vmul.f32 %v360_v41, %v114_v13 }
  0xb3   :  { %v254_v4 = vadd.f32 %v246_v50, %v190_v48  ;;  %v253_v5 = vadd.f32 %v245_v51, %v189_v49 }
  0xb4   :  { %v120_v20 = vpop.permute.xlu1 %119  ;;  %v118_v21 = vpop.permute.xlu0 %117 }
  0xb5   :  { %v248_v10 = vmul.f32 %v363_v58, %v120_v20  ;;  %v247_v11 = vmul.f32 %v362_v61, %v118_v21 }
  0xb7   :  { %v256_v6 = vadd.f32 %v248_v10, %v192_v2  ;;  %v255_v7 = vadd.f32 %v247_v11, %v191_v3 }
  0xb8   :  { %v124_v35 = vpop.permute.xlu1 %123  ;;  %v122_v36 = vpop.permute.xlu0 %121 }
  0xb9   :  { %v306_v42 = vmul.f32 %v365_v28, %v124_v35  ;;  %v305_v43 = vmul.f32 %v364_v29, %v122_v36 }
  0xbb   :  { %v314_v46 = vadd.f32 %v306_v42, %v250_v39  ;;  %v313_v47 = vadd.f32 %v305_v43, %v249_v34 }
  0xbc   :  { %v128_v52 = vpop.permute.xlu1 %127  ;;  %v126_v53 = vpop.permute.xlu0 %125 }
  0xbd   :  { %322 = vst [vmem:[#allocation10 + $0x2] sm:$0x3] %v314_v46  ;;  %321 = vst [vmem:[#allocation10] sm:$0x3] %v313_v47  ;;  %v308_v59 = vmul.f32 %v367_v44, %v128_v52  ;;  %v307_v60 = vmul.f32 %v366_v45, %v126_v53 }
  0xbf   :  { %v316_v0 = vadd.f32 %v308_v59, %v252_v57  ;;  %v315_v1 = vadd.f32 %v307_v60, %v251_v56 }
  0xc0   :  { %v132_v8 = vpop.permute.xlu1 %131  ;;  %v130_v9 = vpop.permute.xlu0 %129 }
  0xc1   :  { %324 = vst [vmem:[#allocation10 + $0x6] sm:$0x3] %v316_v0  ;;  %323 = vst [vmem:[#allocation10 + $0x4] sm:$0x3] %v315_v1  ;;  %v310_v12 = vmul.f32 %v369_v62, %v132_v8  ;;  %v309_v13 = vmul.f32 %v368_v63, %v130_v9 }
  0xc3   :  { %v318_v16 = vadd.f32 %v310_v12, %v254_v4  ;;  %v317_v17 = vadd.f32 %v309_v13, %v253_v5 }
  0xc4   :  { %v136_v18 = vpop.permute.xlu1 %135  ;;  %v134_v19 = vpop.permute.xlu0 %133 }
  0xc5   :  { %326 = vst [vmem:[#allocation10 + $0xa] sm:$0x3] %v318_v16  ;;  %325 = vst [vmem:[#allocation10 + $0x8] sm:$0x3] %v317_v17  ;;  %v312_v22 = vmul.f32 %v371_v14, %v136_v18  ;;  %v311_v23 = vmul.f32 %v370_v15, %v134_v19 }
  0xc7   :  { %v320_v20 = vadd.f32 %v312_v22, %v256_v6  ;;  %v319_v21 = vadd.f32 %v311_v23, %v255_v7 }
  0xc9   :  { %328 = vst [vmem:[#allocation10 + $0xe] sm:$0x3] %v320_v20  ;;  %327 = vst [vmem:[#allocation10 + $0xc] sm:$0x3] %v319_v21 }
  0xca   :  { %474 = shalt.err (!%p471_p10)
}
  0xcb   :  { %340 = dma.vmem_to_hbm [thread:$0]  %s335_s12, 256, %s571_s4, [#allocation4], %s495_s25, %s495_s25, %s496_s26  }
  0xcc   :  { %489 = dma.done.wait [#allocation4], 256  }
  0xcd   :  { %490 = vsyncadd [#allocation4], 4294967040 }
  0xce   :  { %344 = vsyncpa [#allocation3], 1 }
  0xcf   :  { %345 = vsyncpa [#allocation6], 1 }
  0xd0   :  { %346 = vsyncpa [#allocation9], 1 }
  0xd1   :  { %347 = vsyncpa [#allocation4], 1 }

</bundles_post_ra>
